<compile_context>
chip_gen: v7x
topology: tpu7x:2x2x1
jax: 0.10.0
libtpu: 0.0.40
codegen_flags: <defaults>
</compile_context>

<pallas_src>
import functools
import math

import jax
import jax.numpy as jnp
from jax.experimental import pallas as pl
from jax.experimental.pallas import tpu as pltpu


def _round_up(x: int, m: int) -> int:
    return (x + m - 1) // m * m


def _select_tile(dim: int, candidates, floor_align: int) -> int:
    """Pick a tile size minimizing padding waste (ties -> larger tile)."""
    dim = max(dim, 1)
    smallest = candidates[-1]
    if dim <= smallest:
        # Single small tile, padded only up to the alignment floor.
        return min(smallest, _round_up(dim, floor_align))
    best_tile, best_waste = None, None
    for c in candidates:  # descending order
        waste = _round_up(dim, c) - dim
        if best_waste is None or waste < best_waste:
            best_tile, best_waste = c, waste
    return best_tile


# ----------------------------- kernels --------------------------------------
# Direct-accumulate variants (output dtype == float32): the output block is
# resident across the k axis, so accumulate straight into it (no scratch).

def _mm_out_kernel(x_ref, w_ref, o_ref):
    @pl.when(pl.program_id(2) == 0)
    def _init():
        o_ref[...] = jnp.zeros_like(o_ref)

    o_ref[...] += jnp.dot(x_ref[...], w_ref[...],
                          preferred_element_type=jnp.float32)


def _mm_bias_out_kernel(x_ref, w_ref, b_ref, o_ref):
    @pl.when(pl.program_id(2) == 0)
    def _init():
        o_ref[...] = jnp.zeros_like(o_ref)

    o_ref[...] += jnp.dot(x_ref[...], w_ref[...],
                          preferred_element_type=jnp.float32)

    @pl.when(pl.program_id(2) == pl.num_programs(2) - 1)
    def _finalize():
        o_ref[...] += b_ref[...]


# Scratch-accumulator variants (for narrow / bf16 outputs).

def _mm_scratch_kernel(x_ref, w_ref, o_ref, acc_ref):
    k = pl.program_id(2)

    @pl.when(k == 0)
    def _init():
        acc_ref[...] = jnp.zeros_like(acc_ref)

    acc_ref[...] += jnp.dot(x_ref[...], w_ref[...],
                            preferred_element_type=jnp.float32)

    @pl.when(k == pl.num_programs(2) - 1)
    def _finalize():
        o_ref[...] = acc_ref[...].astype(o_ref.dtype)


def _mm_bias_scratch_kernel(x_ref, w_ref, b_ref, o_ref, acc_ref):
    k = pl.program_id(2)

    @pl.when(k == 0)
    def _init():
        acc_ref[...] = jnp.zeros_like(acc_ref)

    acc_ref[...] += jnp.dot(x_ref[...], w_ref[...],
                            preferred_element_type=jnp.float32)

    @pl.when(k == pl.num_programs(2) - 1)
    def _finalize():
        o_ref[...] = (acc_ref[...] + b_ref[...]).astype(o_ref.dtype)


# ----------------------------- wrapper ---------------------------------------

@functools.partial(jax.jit, static_argnames=("n_logical", "tn", "tk"))
def _linear_padded(x, w_padded, b_padded, *, n_logical: int, tn: int, tk: int):
    """y = x @ w_padded (+ b_padded), weight already padded/cast to (k_pad, n_pad)."""
    *lead, K = x.shape
    k_pad, n_pad = w_padded.shape
    assert K <= k_pad and n_logical <= n_pad
    M = math.prod(lead) if lead else 1

    compute_dtype = w_padded.dtype
    out_dtype = x.dtype  # f32 input -> f32 output (matches F.linear reference)

    # --- per-call tile choice for M (16-aligned for bf16 sublane packing) ---
    tm = _select_tile(M, (512, 256, 128), 16)
    m_pad = _round_up(M, tm)

    grid_m, grid_n = m_pad // tm, n_pad // tn
    # Make sure v7x's two TensorCores both get work on small problems
    # (harmless elsewhere: one extra ~0.35us grid step).
    if grid_m * grid_n == 1:
        if n_pad >= 256 and (n_pad // 2) % 128 == 0:
            tn = n_pad // 2
        elif m_pad >= 32 and (m_pad // 2) % 16 == 0:
            tm = m_pad // 2
        grid_m, grid_n = m_pad // tm, n_pad // tn

    # --- activation: reshape, pad, cast (weight/bias were prepared once) ---
    # TODO(synk): in a full model keep activations bf16 end-to-end (fold this
    # cast into the producing op) instead of casting per call.
    x2 = x.reshape(M, K)
    if (m_pad, k_pad) != (M, K):
        x2 = jnp.pad(x2, ((0, m_pad - M), (0, k_pad - K)))
    x2 = x2.astype(compute_dtype)

    grid = (grid_m, grid_n, k_pad // tk)

    x_spec = pl.BlockSpec((tm, tk), lambda i, j, k: (i, k))
    w_spec = pl.BlockSpec((tk, tn), lambda i, j, k: (k, j))
    o_spec = pl.BlockSpec((tm, tn), lambda i, j, k: (i, j))

    itemsize_c = jnp.dtype(compute_dtype).itemsize
    itemsize_o = jnp.dtype(out_dtype).itemsize
    use_scratch = out_dtype != jnp.float32

    # VMEM budget: double-buffered inputs/outputs (+ optional acc scratch),
    # 2x headroom for compiler scratch; floor 32 MiB, cap 48 MiB (safe on
    # v7x's 64 MiB physical VMEM, below v5e/v6e physical 128 MiB).
    buf_bytes = (2 * (tm * tk + tk * tn) * itemsize_c
                 + 2 * tm * tn * itemsize_o
                 + (tm * tn * 4 if use_scratch else 0)
                 + (2 * tn * 4 if b_padded is not None else 0))
    vmem_limit = min(max(2 * buf_bytes, 32 << 20), 48 << 20)

    cost = pl.CostEstimate(
        flops=2 * m_pad * n_pad * k_pad,
        transcendentals=0,
        bytes_accessed=(m_pad * k_pad * itemsize_c
                        + k_pad * n_pad * itemsize_c
                        + m_pad * n_pad * itemsize_o),
    )
    cparams = pltpu.CompilerParams(
        dimension_semantics=("parallel", "parallel", "arbitrary"),
        vmem_limit_bytes=int(vmem_limit),
    )

    in_specs = [x_spec, w_spec]
    operands = [x2, w_padded]
    if b_padded is not None:
        in_specs.append(pl.BlockSpec((1, tn), lambda i, j, k: (0, j)))
        operands.append(b_padded)
        kernel = _mm_bias_scratch_kernel if use_scratch else _mm_bias_out_kernel
    else:
        kernel = _mm_scratch_kernel if use_scratch else _mm_out_kernel

    scratch = [pltpu.VMEM((tm, tn), jnp.float32)] if use_scratch else []

    out = pl.pallas_call(
        kernel,
        out_shape=jax.ShapeDtypeStruct((m_pad, n_pad), out_dtype),
        grid=grid,
        in_specs=in_specs,
        out_specs=o_spec,
        scratch_shapes=scratch,
        compiler_params=cparams,
        cost_estimate=cost,
    )(*operands)

    return out[:M, :n_logical].reshape(*lead, n_logical)


class LinearPallas:
    """JAX/Pallas equivalent of the PyTorch `Linear` module (float32 weights).

    The kernel-feeding weight copy is transposed to (K, N), zero-padded to the
    tile grid and cast to `compute_dtype` ONCE at construction.  Default
    compute_dtype is bfloat16 (f32 accumulation on the MXU); pass
    compute_dtype=jnp.float32 for bitwise-faithful float32 math.
    """

    def __init__(self, in_features: int, out_features: int, bias: bool = False,
                 *, key: jax.Array, compute_dtype=jnp.bfloat16):
        self.in_features = in_features
        self.out_features = out_features
        wkey, bkey = jax.random.split(key)

        # Deterministic synthetic init (torch.empty in the reference is
        # uninitialized; use a small gaussian so results are reproducible).
        self.weight = (jax.random.normal(
            wkey, (out_features, in_features), dtype=jnp.float32)
            * (1.0 / (in_features ** 0.5)))

        # Tiles along K/N are a property of the layer -> choose once,
        # minimizing padding waste, then pad+cast the weight once.
        self.tk = _select_tile(in_features, (1024, 512, 256, 128), 128)
        self.tn = _select_tile(out_features, (512, 256, 128), 128)
        k_pad = _round_up(in_features, self.tk)
        n_pad = _round_up(out_features, self.tn)

        wt = jnp.asarray(self.weight.T)                       # (K, N)
        if (k_pad, n_pad) != (in_features, out_features):
            wt = jnp.pad(wt, ((0, k_pad - in_features), (0, n_pad - out_features)))
        self.weight_t = wt.astype(compute_dtype)              # kernel RHS, lane-dense N

        if bias:
            b = (jax.random.normal(bkey, (out_features,), dtype=jnp.float32)
                 * 0.01).reshape(1, out_features)
            if n_pad != out_features:
                b = jnp.pad(b, ((0, 0), (0, n_pad - out_features)))
            self.bias_padded = b                               # f32, added post-accum
            self.bias = self.bias_padded[0, :out_features]
        else:
            self.bias_padded = None
            self.bias = None

        # TODO(synk): fp8 quantized-weight branch (act_quant + fp8_gemm) of the
        # reference (and int8 weights for v5e) is not implemented; float32/bf16
        # weights only.

    def __call__(self, x):
        return _linear_padded(x, self.weight_t, self.bias_padded,
                              n_logical=self.out_features,
                              tn=self.tn, tk=self.tk)


if __name__ == "__main__":
    key = jax.random.PRNGKey(0)
    kx, k1, k2 = jax.random.split(key, 3)

    batch, seq, in_features, out_features = 2, 8, 32, 64
    x = jax.random.normal(kx, (batch, seq, in_features), dtype=jnp.float32)

    # Default module config (bias=False, bf16 MXU feed, f32 accumulation).
    layer = LinearPallas(in_features, out_features, bias=False, key=k1)
    y = jax.block_until_ready(layer(x))
    y_ref = jnp.einsum("bsk,nk->bsn", x, layer.weight)
    assert y.shape == (batch, seq, out_features)
    # bf16 feed vs f32 reference: looser tolerance (documented numerics change).
    assert jnp.allclose(y, y_ref, atol=7.5e-2, rtol=5e-2), "mismatch (bf16, no bias)"

    # Bias path (bias added in f32 after accumulation).
    layer_b = LinearPallas(in_features, out_features, bias=True, key=k2)
    yb = jax.block_until_ready(layer_b(x))
    yb_ref = jnp.einsum("bsk,nk->bsn", x, layer_b.weight) + layer_b.bias
    assert jnp.allclose(yb, yb_ref, atol=7.5e-2, rtol=5e-2), "mismatch (bf16, bias)"

    # Exact float32 path: matches the PyTorch float32 reference tightly.
    layer_f32 = LinearPallas(in_features, out_features, bias=True, key=k2,
                             compute_dtype=jnp.float32)
    yf = jax.block_until_ready(layer_f32(x))
    yf_ref = jnp.einsum("bsk,nk->bsn", x, layer_f32.weight) + layer_f32.bias
    assert jnp.allclose(yf, yf_ref, atol=1e-5, rtol=1e-5), "mismatch (f32)"

    print("KERNEL_OK")
</pallas_src>

<mosaic_0001>
module attributes {stable_mosaic.version = 11 : i64} {
  func.func @_mm_out_kernel(%arg0: i32, %arg1: i32, %arg2: i32, %arg3: memref<16x128xbf16, #tpu.memory_space<vmem>>, %arg4: memref<128x128xbf16, #tpu.memory_space<vmem>>, %arg5: memref<16x128xf32, #tpu.memory_space<vmem>>) attributes {dimension_semantics = [#tpu.dimension_semantics<parallel>, #tpu.dimension_semantics<parallel>, #tpu.dimension_semantics<arbitrary>], iteration_bounds = array<i64: 1, 1, 1>, scalar_prefetch = 0 : i64, scratch_operands = 0 : i64, tpu.core_type = #tpu.core_type<tc>, window_params = [{transform_indices = @transform_0, window_bounds = array<i64: 16, 128>}, {transform_indices = @transform_1, window_bounds = array<i64: 128, 128>}, {transform_indices = @transform_2, window_bounds = array<i64: 16, 128>}]} {
    %c0_i32 = arith.constant 0 : i32
    %0 = arith.cmpi eq, %arg2, %c0_i32 : i32
    %1 = arith.extui %0 : i1 to i32
    %c0_i32_0 = arith.constant 0 : i32
    %2 = arith.cmpi ne, %1, %c0_i32_0 : i32
    scf.if %2 {
      %cst_8 = arith.constant 0.000000e+00 : f32
      %9 = vector.broadcast %cst_8 : f32 to vector<16x128xf32>
      %c0_9 = arith.constant 0 : index
      %c0_10 = arith.constant 0 : index
      %10 = vector.load %arg5[%c0_9, %c0_10] : memref<16x128xf32, #tpu.memory_space<vmem>>, vector<16x128xf32>
      tpu.vector_store %arg5[%c0_9, %c0_10], %9 {strides = array<i32>} : memref<16x128xf32, #tpu.memory_space<vmem>>, vector<16x128xf32>,
    } else {
    }
    %c0 = arith.constant 0 : index
    %c0_1 = arith.constant 0 : index
    %3 = vector.load %arg5[%c0, %c0_1] : memref<16x128xf32, #tpu.memory_space<vmem>>, vector<16x128xf32>
    %c0_2 = arith.constant 0 : index
    %c0_3 = arith.constant 0 : index
    %4 = vector.load %arg3[%c0_2, %c0_3] : memref<16x128xbf16, #tpu.memory_space<vmem>>, vector<16x128xbf16>
    %c0_4 = arith.constant 0 : index
    %c0_5 = arith.constant 0 : index
    %5 = vector.load %arg4[%c0_4, %c0_5] : memref<128x128xbf16, #tpu.memory_space<vmem>>, vector<128x128xbf16>
    %cst = arith.constant dense<0.000000e+00> : vector<16x128xf32>
    %6 = tpu.matmul %4, %5, %cst {dimension_numbers = #tpu.dot_dimension_numbers<[1], [0], [0], [1], [0, 0, 1, 1], [], []>} : vector<16x128xbf16>, vector<128x128xbf16>, vector<16x128xf32> -> vector<16x128xf32>
    %7 = arith.addf %3, %6 : vector<16x128xf32>
    %c0_6 = arith.constant 0 : index
    %c0_7 = arith.constant 0 : index
    %8 = vector.load %arg5[%c0_6, %c0_7] : memref<16x128xf32, #tpu.memory_space<vmem>>, vector<16x128xf32>
    tpu.vector_store %arg5[%c0_6, %c0_7], %7 {strides = array<i32>} : memref<16x128xf32, #tpu.memory_space<vmem>>, vector<16x128xf32>,
    return
  }
  func.func @transform_0(%arg0: i32, %arg1: i32, %arg2: i32) -> (i32, i32) {
    %c0_i32 = arith.constant 0 : i32
    return %arg0, %arg2 : i32, i32
  }
  func.func @transform_1(%arg0: i32, %arg1: i32, %arg2: i32) -> (i32, i32) {
    %c0_i32 = arith.constant 0 : i32
    return %arg2, %arg1 : i32, i32
  }
  func.func @transform_2(%arg0: i32, %arg1: i32, %arg2: i32) -> (i32, i32) {
    %c0_i32 = arith.constant 0 : i32
    return %arg0, %arg1 : i32, i32
  }
}

</mosaic_0001>

<bundles_post_ra>
// kernel: _linear_padded.1
= control target key start
LH: loop header
LB: loop body
LE: loop exit
PB: predicated region body
PF: predicated region fallthrough
CT: control target
= control target key end

     0   :  { %7 = vsyncpa [#allocation3], 0  ;;  %s232_s9 = smov [#allocation2]   ;;  %s273_s0 = inlined_call_operand.vmem [shape: bf16[16,128], index: 0, kind: input, shape index: {}]   ;;  %s274_s1 = inlined_call_operand.hbm [shape: bf16[128,128], index: 1, kind: input, shape index: {}]   ;;  %s275_s2 = inlined_call_operand.vmem [shape: f32[16,128], index: 2, kind: output, shape index: {}]  }
   0x1   :  { %s15_s10 = sshll.u32 %s232_s9, 4  ;;  %s208_s13 = scalar_lea.hbm %s274_s1, 1024  ;;  %s16_s10 = int_to_ptr.vmem [resolvable:$true] %s15_s10 }
   0x2   :  { %p209_p0 = scmp.ne.s32.totalorder %s274_s1, %s208_s13  ;;  %p212_p1 = scmp.lt.u32.totalorder %s208_s13, %s274_s1 }
   0x4   :  { %p214_p2 = pnand %p212_p1, %p209_p0 }
   0x6   :  { %217 = shalt.err (!%p214_p2)
}
   0x7   :  { %s218_s18 = scalar_lea.vmem %s16_s10, 1024  ;;  %p223_p4 = scmp.lt.s32.totalorder %s16_s10, %s16_s10 }
   0x8   :  { %p219_p3 = scmp.ne.s32.totalorder %s16_s10, %s218_s18  ;;  %p224_p5 = scmp.lt.s32.totalorder %s218_s18, %s218_s18 }
   0xa   :  { %p225_p6 = por %p224_p5, %p223_p4 }
   0xc   :  { %p226_p7 = pnand %p225_p6, %p219_p3 }
   0xe   :  { %229 = shalt.err (!%p226_p7)
}
   0xf   :  { %s233_s19 = smov 64   ;;  %s234_s20 = smov 4  }
  0x10   :  { %21 = dma.hbm_to_vmem [thread:$0]  %s274_s1, 1024, %s16_s10, [#allocation3], %s233_s19, %s233_s19, %s234_s20  }
  0x11   :  { %230 = dma.done.wait [#allocation3], 1024  }
  0x12   :  { %231 = vsyncadd [#allocation3], 4294966272  ;;  %v235_v0 = vmov 0.0   ;;  %vm236_vm0 = vmmov 0   ;;  %v199_v1 = vld [vmem:[#allocation2] sm:$0xff]   ;;  %v200_v2 = vld [vmem:[#allocation2 + $0x8] sm:$0xff]  }
  0x13   :  { %174 = vmatprep.subr.bf16.mxu0 %v235_v0  ;;  %190 = vmatprep.mubr.msk.bf16.mxu0 %vm236_vm0, %v235_v0  ;;  %v201_v3 = vld [vmem:[#allocation2 + $0x10] sm:$0xff]   ;;  %v202_v4 = vld [vmem:[#allocation2 + $0x18] sm:$0xff]   ;;  %v203_v5 = vld [vmem:[#allocation2 + $0x20] sm:$0xff]  }
  0x14   :  { %175 = vmatpush3.bf16.msra.mxu0 %v199_v1  ;;  %v204_v6 = vld [vmem:[#allocation2 + $0x28] sm:$0xff]   ;;  %v205_v7 = vld [vmem:[#allocation2 + $0x30] sm:$0xff]   ;;  %v206_v8 = vld [vmem:[#allocation2 + $0x38] sm:$0xff]  }
  0x15   :  { %176 = vmatprep.subr.bf16.mxu0 %v235_v0  ;;  %v207_v9 = vld [vmem:[%s273_s0] sm:$0xff]  }
  0x18   :  { %177 = vmatpush3.bf16.msra.mxu0 %v200_v2 }
  0x19   :  { %178 = vmatprep.subr.bf16.mxu0 %v235_v0 }
  0x1c   :  { %179 = vmatpush3.bf16.msra.mxu0 %v201_v3 }
  0x1d   :  { %180 = vmatprep.subr.bf16.mxu0 %v235_v0 }
  0x20   :  { %181 = vmatpush3.bf16.msra.mxu0 %v202_v4 }
  0x21   :  { %182 = vmatprep.subr.bf16.mxu0 %v235_v0 }
  0x24   :  { %183 = vmatpush3.bf16.msra.mxu0 %v203_v5 }
  0x25   :  { %184 = vmatprep.subr.bf16.mxu0 %v235_v0 }
  0x28   :  { %185 = vmatpush3.bf16.msra.mxu0 %v204_v6 }
  0x29   :  { %186 = vmatprep.subr.bf16.mxu0 %v235_v0 }
  0x2c   :  { %187 = vmatpush3.bf16.msra.mxu0 %v205_v7 }
  0x2d   :  { %188 = vmatprep.subr.bf16.mxu0 %v235_v0 }
  0x30   :  { %189 = vmatpush3.bf16.msra.mxu0 %v206_v8 }
  0x33   :  { %191 = vmatmul.mubr.bf16.vlgmr.msra.gmra.mrb[0].mxu0 %v207_v9 }
 0x106   :  { %v140_v10 = vpop.f32.mrb[0].mxu0 }
 0x107   :  { %v192_v11 = vpop.f32.mrb[1].mxu0  ;;  %149 = vst [vmem:[%s275_s2] sm:$0xff] %v140_v10 }
 0x108   :  { %v143_v12 = vpop.f32.mrb[2].mxu0 }
 0x109   :  { %v193_v13 = vpop.f32.mrb[3].mxu0  ;;  %150 = vst [vmem:[%s275_s2 + $0x8] sm:$0xff] %v143_v12 }
 0x10a   :  { %155 = vsyncpa [#allocation3], 1 }

</bundles_post_ra>
